<compile_context>
chip_gen: v5e
topology: v5e:2x2
jax: 0.10.0
libtpu: 0.0.40
codegen_flags: <defaults>
</compile_context>

<pallas_src>
import functools
import math

import jax
import jax.numpy as jnp
import numpy as np
from jax.experimental import pallas as pl
from jax.experimental.pallas import tpu as pltpu


def _simam_kernel(x_ref, o_ref, *, n, e_lambda):
    """x_ref/o_ref: (ROWS, HW) = (B*C, H*W) VMEM tiles."""
    x = x_ref[...].astype(jnp.float32)                       # (ROWS, HW)

    # Per-row (i.e. per (b, c)) spatial statistics along the lane axis.
    mu = jnp.mean(x, axis=-1, keepdims=True)                  # (ROWS, 1)
    d = x - mu
    d2 = d * d                                                # (x - mu)^2

    # denom = 4 * (sum(d2)/n + e_lambda), one scalar per row.
    denom = 4.0 * (jnp.sum(d2, axis=-1, keepdims=True) * (1.0 / n) + e_lambda)
    inv_denom = pl.reciprocal(denom, approx=False)            # exact; (ROWS, 1)

    y = d2 * inv_denom + 0.5
    o_ref[...] = (x * jax.nn.sigmoid(y)).astype(o_ref.dtype)


def simam_forward(x, e_lambda=1e-4):
    """x: (B, C, H, W). Returns x * sigmoid(y) exactly like the PyTorch module."""
    b, c, h, w = x.shape
    rows, hw = b * c, h * w
    n = float(hw - 1)

    # Fold batch*channel into the sublane axis, spatial into the lane axis.
    x2 = x.reshape(rows, hw)

    kernel = functools.partial(_simam_kernel, n=n, e_lambda=float(e_lambda))

    out = pl.pallas_call(
        kernel,
        out_shape=jax.ShapeDtypeStruct((rows, hw), x.dtype),
        grid_spec=pltpu.PrefetchScalarGridSpec(
            num_scalar_prefetch=0,
            grid=(1,),  # single grid step: whole problem is one (rows, hw) slab
            in_specs=[pl.BlockSpec((rows, hw), lambda i: (0, 0))],
            out_specs=pl.BlockSpec((rows, hw), lambda i: (0, 0)),
        ),
        compiler_params=pltpu.CompilerParams(
            dimension_semantics=("arbitrary",),
        ),
    )(x2)

    return out.reshape(b, c, h, w)


def reference_simam(x, e_lambda=1e-4):
    """Pure-JAX mirror of the PyTorch SimAM.forward."""
    b, c, h, w = x.shape
    n = w * h - 1
    mu = jnp.mean(x, axis=(2, 3), keepdims=True)
    d2 = (x - mu) ** 2
    y = d2 / (4.0 * (jnp.sum(d2, axis=(2, 3), keepdims=True) / n + e_lambda)) + 0.5
    return x * jax.nn.sigmoid(y)


if __name__ == "__main__":
    key = jax.random.PRNGKey(0)
    B, C, H, W = 2, 4, 16, 16  # small shapes consistent with the module's (b, c, h, w) input
    x = jax.random.normal(key, (B, C, H, W), jnp.float32)

    out = simam_forward(x, e_lambda=1e-4)
    out = jax.block_until_ready(out)

    ref = reference_simam(x, e_lambda=1e-4)
    np.testing.assert_allclose(np.asarray(out), np.asarray(ref), rtol=1e-5, atol=1e-5)

    print("KERNEL_OK")
</pallas_src>

<mosaic_0001>
module attributes {stable_mosaic.version = 11 : i64} {
  func.func @_simam_kernel(%arg0: i32, %arg1: memref<8x256xf32, #tpu.memory_space<vmem>>, %arg2: memref<8x256xf32, #tpu.memory_space<vmem>>) attributes {dimension_semantics = [#tpu.dimension_semantics<arbitrary>], iteration_bounds = array<i64: 1>, scalar_prefetch = 0 : i64, scratch_operands = 0 : i64, tpu.core_type = #tpu.core_type<tc>, window_params = [{pipeline_mode = #tpu.pipeline_mode<synchronous>, transform_indices = @transform_0, window_bounds = array<i64: 8, 256>}, {pipeline_mode = #tpu.pipeline_mode<synchronous>, transform_indices = @transform_1, window_bounds = array<i64: 8, 256>}]} {
    %c0 = arith.constant 0 : index
    %c0_0 = arith.constant 0 : index
    %0 = vector.load %arg1[%c0, %c0_0] : memref<8x256xf32, #tpu.memory_space<vmem>>, vector<8x256xf32>
    %cst = arith.constant dense<0.000000e+00> : vector<8xf32>
    %1 = vector.multi_reduction <add>, %0, %cst [1] : vector<8x256xf32> to vector<8xf32>
    %2 = vector.shape_cast %1 : vector<8xf32> to vector<8x1xf32>
    %cst_1 = arith.constant 2.560000e+02 : f32
    %3 = vector.broadcast %cst_1 : f32 to vector<8x1xf32>
    %4 = arith.divf %2, %3 : vector<8x1xf32>
    %5 = vector.broadcast %4 : vector<8x1xf32> to vector<8x256xf32>
    %6 = arith.subf %0, %5 : vector<8x256xf32>
    %7 = arith.mulf %6, %6 : vector<8x256xf32>
    %cst_2 = arith.constant dense<0.000000e+00> : vector<8xf32>
    %8 = vector.multi_reduction <add>, %7, %cst_2 [1] : vector<8x256xf32> to vector<8xf32>
    %9 = vector.shape_cast %8 : vector<8xf32> to vector<8x1xf32>
    %cst_3 = arith.constant 0.00392156886 : f32
    %10 = vector.broadcast %cst_3 : f32 to vector<8x1xf32>
    %11 = arith.mulf %9, %10 : vector<8x1xf32>
    %cst_4 = arith.constant 9.99999974E-5 : f32
    %12 = vector.broadcast %cst_4 : f32 to vector<8x1xf32>
    %13 = arith.addf %11, %12 : vector<8x1xf32>
    %cst_5 = arith.constant 4.000000e+00 : f32
    %14 = vector.broadcast %cst_5 : f32 to vector<8x1xf32>
    %15 = arith.mulf %14, %13 : vector<8x1xf32>
    %16 = tpu.reciprocal %15 : vector<8x1xf32> -> vector<8x1xf32>
    %17 = vector.broadcast %16 : vector<8x1xf32> to vector<8x256xf32>
    %18 = arith.mulf %7, %17 : vector<8x256xf32>
    %cst_6 = arith.constant 5.000000e-01 : f32
    %19 = vector.broadcast %cst_6 : f32 to vector<8x256xf32>
    %20 = arith.addf %18, %19 : vector<8x256xf32>
    %21 = arith.negf %20 : vector<8x256xf32>
    %22 = math.exp %21 : vector<8x256xf32>
    %cst_7 = arith.constant 1.000000e+00 : f32
    %23 = vector.broadcast %cst_7 : f32 to vector<8x256xf32>
    %24 = arith.addf %23, %22 : vector<8x256xf32>
    %25 = arith.divf %23, %24 : vector<8x256xf32>
    %26 = arith.mulf %0, %25 : vector<8x256xf32>
    %c0_8 = arith.constant 0 : index
    %c0_9 = arith.constant 0 : index
    %27 = vector.load %arg2[%c0_8, %c0_9] : memref<8x256xf32, #tpu.memory_space<vmem>>, vector<8x256xf32>
    tpu.vector_store %arg2[%c0_8, %c0_9], %26 {strides = array<i32>} : memref<8x256xf32, #tpu.memory_space<vmem>>, vector<8x256xf32>,
    return
  }
  func.func @transform_0(%arg0: i32) -> (i32, i32) {
    %c0_i32 = arith.constant 0 : i32
    %c0_i32_0 = arith.constant 0 : i32
    %c0_i32_1 = arith.constant 0 : i32
    return %c0_i32, %c0_i32_0 : i32, i32
  }
  func.func @transform_1(%arg0: i32) -> (i32, i32) {
    %c0_i32 = arith.constant 0 : i32
    %c0_i32_0 = arith.constant 0 : i32
    %c0_i32_1 = arith.constant 0 : i32
    return %c0_i32, %c0_i32_0 : i32, i32
  }
}

</mosaic_0001>

<bundles_post_ra>
// kernel: tpu_custom_call.1
= control target key start
LH: loop header
LB: loop body
LE: loop exit
PB: predicated region body
PF: predicated region fallthrough
CT: control target
= control target key end

     0   :  { %6 = vsyncpa [#allocation3], 0  ;;  %s221_s0 = inlined_call_operand.hbm [shape: f32[8,256], index: 0, kind: input, shape index: {}]   ;;  %s222_s1 = inlined_call_operand.hbm [shape: f32[8,256], index: 1, kind: output, shape index: {}]  }
   0x1   :  { %7 = vsyncpa [#allocation4], 0  ;;  %s13_s8 = sshll.u32 %s221_s0, 4  ;;  %s192_s9 = smov [#allocation2]   ;;  %s14_s8 = int_to_ptr.hbm [resolvable:$true] %s13_s8 }
   0x2   :  { %s15_s10 = sshll.u32 %s192_s9, 4  ;;  %s16_s10 = int_to_ptr.vmem [resolvable:$true] %s15_s10 }
   0x3   :  { %18 = dma.hbm_to_vmem [thread:$0]  %s14_s8, 256, %s16_s10, [#allocation3]  }
   0x4   :  { %188 = dma.done.wait [#allocation3], 256  }
   0x5   :  { %189 = vsyncadd [#allocation3], 4294967040  ;;  %v208_v0 = vld [vmem:[#allocation2] sm:$0xff]  ;;  %v210_v1 = vld [vmem:[#allocation2 + $0x8] sm:$0xff]  ;;  %v193_v3 = vmov 256.0   ;;  %s194_s0 = smov [#allocation5]  }
   0x6   :  { %v25_v2 = vadd.f32 %v210_v1, %v208_v0  ;;  %128 = vrcp.f32 %v193_v3  ;;  %s111_s11 = sshll.u32 %s194_s0, 4  ;;  %s113_s14 = sshll.u32 %s222_s1, 4  ;;  %s112_s11 = int_to_ptr.vmem [resolvable:$true] %s111_s11  ;;  %s114_s14 = int_to_ptr.hbm [resolvable:$true] %s113_s14 }
   0x8   :  { %26 = vadd.xlane.f32.xlu0 %v25_v2 }
   0xc   :  { %v129_v4 = vpop.eup %128 }
   0xd   :  { %v29_v5 = vmul.f32 256.0, %v129_v4  ;;  %vm33_vm0 = vweird.f32 %v129_v4 }
   0xf   :  { %v30_v6 = vsub.f32 1.0, %v29_v5 }
  0x11   :  { %v31_v7 = vmul.f32 %v129_v4, %v30_v6 }
  0x13   :  { %v32_v8 = vadd.f32 %v129_v4, %v31_v7 }
  0x15   :  { %v34_v9 = vsel %vm33_vm0, %v129_v4, %v32_v8 }
  0x7b   :  { %v27_v10 = vpop.xlane.xlu0 %26 }
  0x7c   :  { %v35_v11 = vmul.f32 %v34_v9, %v27_v10 }
  0x7e   :  { %v36_v12 = vsub.f32 %v208_v0, %v35_v11  ;;  %v37_v13 = vsub.f32 %v210_v1, %v35_v11 }
  0x80   :  { %v38_v14 = vmul.f32 %v36_v12, %v36_v12  ;;  %v39_v15 = vmul.f32 %v37_v13, %v37_v13 }
  0x82   :  { %v40_v16 = vadd.f32 %v39_v15, %v38_v14 }
  0x84   :  { %41 = vadd.xlane.f32.xlu0 %v40_v16 }
  0xf7   :  { %v42_v17 = vpop.xlane.xlu0 %41 }
  0xf8   :  { %v43_v18 = vmul.f32 0.003921569, %v42_v17 }
  0xfa   :  { %v44_v19 = vadd.f32 0.0001, %v43_v18 }
  0xfc   :  { %v45_v20 = vmul.f32 4.0, %v44_v19 }
  0xfe   :  { %130 = vrcp.f32 %v45_v20  ;;  %v57_v24 = vand.u32 2147483648, %v45_v20  ;;  %v55_v26 = vand.u32 2147483647, %v45_v20  ;;  %vm51_vm2 = vweird.f32 %v45_v20 }
 0x100   :  { %v58_v28 = vor.u32 1.1754944e-38, %v57_v24  ;;  %vm56_vm4 = vcmp.eq.f32.partialorder %v55_v26, 8.507059e+37 }
 0x104   :  { %v131_v21 = vpop.eup %130 }
 0x105   :  { %v47_v22 = vmul.f32 %v131_v21, %v45_v20  ;;  %vm52_vm1 = vweird.f32 %v131_v21 }
 0x106   :  { %vm53_vm3 = vmor %vm51_vm2, %vm52_vm1 }
 0x107   :  { %v48_v23 = vsub.f32 1.0, %v47_v22 }
 0x109   :  { %v49_v25 = vmul.f32 %v131_v21, %v48_v23 }
 0x10b   :  { %v50_v27 = vadd.f32 %v131_v21, %v49_v25 }
 0x10d   :  { %v54_v29 = vsel %vm53_vm3, %v131_v21, %v50_v27 }
 0x10e   :  { %v59_v30 = vsel %vm56_vm4, %v58_v28, %v54_v29 }
 0x10f   :  { %v60_v31 = vmul.f32 %v59_v30, %v38_v14  ;;  %v61_v32 = vmul.f32 %v59_v30, %v39_v15 }
 0x111   :  { %v62_v33 = vadd.f32 0.5, %v60_v31  ;;  %v63_v34 = vadd.f32 0.5, %v61_v32 }
 0x113   :  { %v123_v35 = vmul.f32 -1.442695, %v62_v33  ;;  %v124_v36 = vmul.f32 -1.442695, %v63_v34 }
 0x115   :  { %132 = vpow2.f32 %v123_v35 }
 0x116   :  { %134 = vpow2.f32 %v124_v36 }
 0x11b   :  { %v133_v37 = vpop.eup %132 }
 0x11c   :  { %v135_v38 = vpop.eup %134  ;;  %v70_v39 = vadd.f32 1.0, %v133_v37 }
 0x11d   :  { %v71_v40 = vadd.f32 1.0, %v135_v38 }
 0x11e   :  { %136 = vrcp.f32 %v70_v39  ;;  %v83_v46 = vand.u32 2147483648, %v70_v39  ;;  %v81_v49 = vand.u32 2147483647, %v70_v39  ;;  %vm77_vm7 = vweird.f32 %v70_v39 }
 0x11f   :  { %138 = vrcp.f32 %v71_v40  ;;  %v98_v50 = vand.u32 2147483648, %v71_v40  ;;  %v96_v52 = vand.u32 2147483647, %v71_v40  ;;  %vm92_vm9 = vweird.f32 %v71_v40 }
 0x120   :  { %v84_v54 = vor.u32 1.1754944e-38, %v83_v46  ;;  %vm82_vm10 = vcmp.eq.f32.partialorder %v81_v49, 8.507059e+37 }
 0x121   :  { %v99_v57 = vor.u32 1.1754944e-38, %v98_v50  ;;  %vm97_vm12 = vcmp.eq.f32.partialorder %v96_v52, 8.507059e+37 }
 0x124   :  { %v137_v41 = vpop.eup %136 }
 0x125   :  { %v139_v42 = vpop.eup %138  ;;  %v73_v43 = vmul.f32 %v137_v41, %v70_v39  ;;  %vm78_vm5 = vweird.f32 %v137_v41 }
 0x126   :  { %v88_v44 = vmul.f32 %v139_v42, %v71_v40  ;;  %vm93_vm6 = vweird.f32 %v139_v42  ;;  %vm79_vm8 = vmor %vm77_vm7, %vm78_vm5 }
 0x127   :  { %v74_v45 = vsub.f32 1.0, %v73_v43  ;;  %vm94_vm11 = vmor %vm92_vm9, %vm93_vm6 }
 0x128   :  { %v89_v47 = vsub.f32 1.0, %v88_v44 }
 0x129   :  { %v75_v48 = vmul.f32 %v137_v41, %v74_v45 }
 0x12a   :  { %v90_v51 = vmul.f32 %v139_v42, %v89_v47 }
 0x12b   :  { %v76_v53 = vadd.f32 %v137_v41, %v75_v48 }
 0x12c   :  { %v91_v55 = vadd.f32 %v139_v42, %v90_v51 }
 0x12d   :  { %v80_v56 = vsel %vm79_vm8, %v137_v41, %v76_v53 }
 0x12e   :  { %v85_v58 = vsel %vm82_vm10, %v84_v54, %v80_v56  ;;  %v95_v59 = vsel %vm94_vm11, %v139_v42, %v91_v55 }
 0x12f   :  { %v100_v60 = vsel %vm97_vm12, %v99_v57, %v95_v59  ;;  %v102_v61 = vmul.f32 %v85_v58, %v208_v0 }
 0x130   :  { %v103_v62 = vmul.f32 %v100_v60, %v210_v1 }
 0x131   :  { %104 = vst [vmem:[#allocation5] sm:$0xff] %v102_v61 }
 0x132   :  { %105 = vst [vmem:[#allocation5 + $0x8] sm:$0xff] %v103_v62 }
 0x133   :  { %116 = dma.vmem_to_hbm [thread:$0]  %s112_s11, 256, %s114_s14, [#allocation4]  }
 0x134   :  { %190 = dma.done.wait [#allocation4], 256  }
 0x135   :  { %191 = vsyncadd [#allocation4], 4294967040 }
 0x136   :  { %121 = vsyncpa [#allocation3], 1 }
 0x137   :  { %122 = vsyncpa [#allocation4], 1 }

</bundles_post_ra>
